<compile_context>
chip_gen: v5e
topology: v5e:2x2
jax: 0.10.0
libtpu: 0.0.40
codegen_flags: <defaults>
</compile_context>

<pallas_src>
import math

import jax
import jax.numpy as jnp
import numpy as np
from jax import lax
from jax.experimental import pallas as pl
from jax.experimental.pallas import tpu as pltpu

# ------------------------ model config (small synthetic) ------------------------
D_MODEL = 32
NHEAD = 4
HEAD_DIM = D_MODEL // NHEAD
L_Q = 8      # number of target queries
L_KV = 16    # number of memory tokens
BATCH = 2
LN_EPS = 1e-5
SCALE = 1.0 / math.sqrt(HEAD_DIM)
NEG_INF = -1e30

RQ = L_Q * BATCH      # 16 flattened query rows
RK = L_KV * BATCH     # 32 flattened key/value rows


# ------------------------------ Pallas kernel -----------------------------------
def dm_layer_kernel(act_ref, par_ref, out_ref):
    D, H, HD = D_MODEL, NHEAD, HEAD_DIM

    # Activation slab rows (row-major flatten of (L, B, D): row r <-> (l=r//B, b=r%B)):
    #   [0:RQ)        tgt
    #   [RQ:2RQ)      query_pos
    #   [2RQ:2RQ+RK)  memory
    #   [2RQ+RK:...)  pos
    acts = act_ref[...]                                   # (2*RQ + 2*RK, D) = (96, 32)
    par = par_ref[...]                                    # (40, 128)

    w_all = par[0:D, :]                                   # (32, 128) = [wq | wk | wv | wo]
    wo = par[0:D, 3 * D:4 * D]                            # (32, 32)
    bq = par[D:D + 1, 0 * D:1 * D]
    bk = par[D:D + 1, 1 * D:2 * D]
    bv = par[D:D + 1, 2 * D:3 * D]
    bo = par[D:D + 1, 3 * D:4 * D]
    gamma = par[D + 1:D + 2, 0 * D:1 * D]
    beta = par[D + 1:D + 2, 1 * D:2 * D]

    # One fused MXU issue covering the q/k/v projections of every activation row.
    proj = jnp.dot(acts, w_all, preferred_element_type=jnp.float32)     # (96, 128)

    o_tgt, o_qp, o_mem, o_pos = 0, RQ, 2 * RQ, 2 * RQ + RK
    tgt = acts[o_tgt:o_tgt + RQ, :]                       # residual input (16, 32)

    # Positional add distributed through the linear map: (x+p)@W = x@W + p@W.
    q = proj[o_tgt:o_tgt + RQ, 0 * D:1 * D] + proj[o_qp:o_qp + RQ, 0 * D:1 * D] + bq
    k = proj[o_mem:o_mem + RK, 1 * D:2 * D] + proj[o_pos:o_pos + RK, 1 * D:2 * D] + bk
    v = proj[o_mem:o_mem + RK, 2 * D:3 * D] + bv

    # Head-major stacks from tiny lane slices (H=4, HD=8).
    def heads(x):
        return jnp.stack([x[:, h * HD:(h + 1) * HD] for h in range(H)], axis=0)

    qh = heads(q)                                         # (H, RQ, HD)
    kh = heads(k)                                         # (H, RK, HD)
    vh = heads(v)                                         # (H, RK, HD)

    # All-pairs scores over flattened rows; cross-batch pairs removed with one additive
    # 0/-inf bias (bitwise AND -- BATCH is a power of two) shared by all heads.
    s = jnp.einsum('hqd,hkd->hqk', qh, kh,
                   preferred_element_type=jnp.float32) * SCALE          # (H, RQ, RK)
    qi = lax.broadcasted_iota(jnp.int32, (RQ, RK), 0)
    kj = lax.broadcasted_iota(jnp.int32, (RQ, RK), 1)
    if BATCH & (BATCH - 1) == 0:
        same_batch = (qi & (BATCH - 1)) == (kj & (BATCH - 1))
    else:  # static fallback for non-power-of-two batch
        same_batch = (qi % BATCH) == (kj % BATCH)
    mask_bias = jnp.where(same_batch, 0.0, NEG_INF)                     # (RQ, RK)
    s = s + mask_bias

    # Numerically-stable, EXACT softmax (every query row has L_KV valid keys, so no 0/0).
    s = s - jnp.max(s, axis=-1, keepdims=True)
    p = jnp.exp(s)
    p = p / jnp.sum(p, axis=-1, keepdims=True)

    oh = jnp.einsum('hqk,hkd->hqd', p, vh,
                    preferred_element_type=jnp.float32)                 # (H, RQ, HD)

    # Output projection applied per head, then accumulated over heads with a leading-axis
    # sum (plain VALU adds) -- no lane-concat relayout.
    wo_h = wo.reshape(H, HD, D)                                         # leading-dim split
    tgt2 = jnp.einsum('hqd,hdm->hqm', oh, wo_h,
                      preferred_element_type=jnp.float32)               # (H, RQ, D)
    tgt2 = jnp.sum(tgt2, axis=0) + bo                                   # (RQ, D)

    # Residual (dropout p = 0.0) + LayerNorm over the feature dim.
    x = tgt + tgt2
    mu = jnp.mean(x, axis=-1, keepdims=True)
    xc = x - mu
    var = jnp.mean(xc * xc, axis=-1, keepdims=True)
    y = xc * lax.rsqrt(var + LN_EPS)
    out_ref[...] = y * gamma + beta


# ------------------------------ wrapper ------------------------------------------
@jax.jit
def dm_layer_forward(tgt, memory, pos, query_pos, param_slab):
    """tgt/query_pos: (L_Q, B, D); memory/pos: (L_KV, B, D). Returns (L_Q, B, D)."""
    LQ, B, D = tgt.shape
    LKV = memory.shape[0]

    # Row-major flatten (metadata) + one concat -> a single activation slab => 1 DMA.
    act = jnp.concatenate(
        [tgt.reshape(LQ * B, D), query_pos.reshape(LQ * B, D),
         memory.reshape(LKV * B, D), pos.reshape(LKV * B, D)], axis=0)

    vmem = pl.BlockSpec(memory_space=pltpu.MemorySpace.VMEM)
    out = pl.pallas_call(
        dm_layer_kernel,
        out_shape=jax.ShapeDtypeStruct((LQ * B, D), jnp.float32),
        in_specs=[vmem, vmem],
        out_specs=vmem,
    )(act, param_slab)
    return out.reshape(LQ, B, D)


# ------------------------------ reference (pure JAX) ------------------------------
def dm_layer_reference(tgt, memory, pos, query_pos, params):
    q_in = tgt + query_pos          # (L_Q, B, D)
    k_in = memory + pos             # (L_KV, B, D)
    v_in = memory

    q = q_in @ params["wq"] + params["bq"]
    k = k_in @ params["wk"] + params["bk"]
    v = v_in @ params["wv"] + params["bv"]

    qh = q.reshape(L_Q, BATCH, NHEAD, HEAD_DIM)
    kh = k.reshape(L_KV, BATCH, NHEAD, HEAD_DIM)
    vh = v.reshape(L_KV, BATCH, NHEAD, HEAD_DIM)

    s = jnp.einsum("qbhd,kbhd->bhqk", qh, kh) * SCALE
    p = jax.nn.softmax(s, axis=-1)
    oh = jnp.einsum("bhqk,kbhd->qbhd", p, vh)            # (L_Q, B, H, HD)
    o = oh.reshape(L_Q, BATCH, D_MODEL)
    tgt2 = o @ params["wo"] + params["bo"]

    x = tgt + tgt2
    mu = jnp.mean(x, axis=-1, keepdims=True)
    var = jnp.mean((x - mu) ** 2, axis=-1, keepdims=True)
    y = (x - mu) / jnp.sqrt(var + LN_EPS)
    return y * params["gamma"] + params["beta"]


# ------------------------------ params ------------------------------------------
def xavier_uniform(key, shape):
    fan_in, fan_out = shape[0], shape[1]
    bound = math.sqrt(6.0 / (fan_in + fan_out))
    return jax.random.uniform(key, shape, jnp.float32, -bound, bound)


def init_params(key):
    ks = jax.random.split(key, 4)
    return {
        "wq": xavier_uniform(ks[0], (D_MODEL, D_MODEL)),
        "bq": jnp.zeros((1, D_MODEL), jnp.float32),
        "wk": xavier_uniform(ks[1], (D_MODEL, D_MODEL)),
        "bk": jnp.zeros((1, D_MODEL), jnp.float32),
        "wv": xavier_uniform(ks[2], (D_MODEL, D_MODEL)),
        "bv": jnp.zeros((1, D_MODEL), jnp.float32),
        "wo": xavier_uniform(ks[3], (D_MODEL, D_MODEL)),
        "bo": jnp.zeros((1, D_MODEL), jnp.float32),
        "gamma": jnp.ones((1, D_MODEL), jnp.float32),   # LayerNorm weight
        "beta": jnp.zeros((1, D_MODEL), jnp.float32),   # LayerNorm bias
    }


def pack_params(p):
    """Pack all 10 parameters into one lane-dense (40, 128) slab (one DMA).

    rows 0..31 : [wq | wk | wv | wo]           (32, 128)
    row  32    : [bq | bk | bv | bo]           (1, 128)
    row  33    : [gamma | beta | 0 | 0]        (1, 128)
    rows 34..39: zero padding to a multiple of 8 sublanes.
    """
    D = D_MODEL
    w_all = jnp.concatenate([p["wq"], p["wk"], p["wv"], p["wo"]], axis=1)       # (32, 128)
    row_b = jnp.concatenate([p["bq"], p["bk"], p["bv"], p["bo"]], axis=1)       # (1, 128)
    row_ln = jnp.concatenate(
        [p["gamma"], p["beta"], jnp.zeros((1, 2 * D), jnp.float32)], axis=1)    # (1, 128)
    pad = jnp.zeros((6, 4 * D), jnp.float32)
    return jnp.concatenate([w_all, row_b, row_ln, pad], axis=0)                 # (40, 128)


# ------------------------------ main ---------------------------------------------
if __name__ == "__main__":
    key = jax.random.PRNGKey(0)
    k_p, k_t, k_m, k_pos, k_qp = jax.random.split(key, 5)

    params = init_params(k_p)
    param_slab = pack_params(params)

    tgt = jax.random.normal(k_t, (L_Q, BATCH, D_MODEL), jnp.float32)
    memory = jax.random.normal(k_m, (L_KV, BATCH, D_MODEL), jnp.float32)
    pos = jax.random.normal(k_pos, (L_KV, BATCH, D_MODEL), jnp.float32)
    query_pos = jax.random.normal(k_qp, (L_Q, BATCH, D_MODEL), jnp.float32)

    out = dm_layer_forward(tgt, memory, pos, query_pos, param_slab)
    out = jax.block_until_ready(out)

    ref = dm_layer_reference(tgt, memory, pos, query_pos, params)
    # Softmax is exact now; tolerance only needs to cover FP reassociation from the fused
    # QKV projection and MXU default-precision rounding on real hardware.
    np.testing.assert_allclose(np.asarray(out), np.asarray(ref), atol=2e-3, rtol=2e-3)

    print("KERNEL_OK")
</pallas_src>

<mosaic_0001>
module attributes {stable_mosaic.version = 11 : i64} {
  func.func @dm_layer_kernel(%arg0: memref<96x32xf32, #tpu.memory_space<vmem>>, %arg1: memref<40x128xf32, #tpu.memory_space<vmem>>, %arg2: memref<16x32xf32, #tpu.memory_space<vmem>>) attributes {dimension_semantics = [], scalar_prefetch = 0 : i64, scratch_operands = 0 : i64, tpu.core_type = #tpu.core_type<tc>} {
    %c0 = arith.constant 0 : index
    %c0_0 = arith.constant 0 : index
    %0 = vector.load %arg0[%c0, %c0_0] : memref<96x32xf32, #tpu.memory_space<vmem>>, vector<96x32xf32>
    %c0_1 = arith.constant 0 : index
    %c0_2 = arith.constant 0 : index
    %1 = vector.load %arg1[%c0_1, %c0_2] : memref<40x128xf32, #tpu.memory_space<vmem>>, vector<40x128xf32>
    %2 = vector.extract_strided_slice %1 {offsets = [0, 0], sizes = [32, 128], strides = [1, 1]} : vector<40x128xf32> to vector<32x128xf32>
    %3 = vector.extract_strided_slice %1 {offsets = [0, 96], sizes = [32, 32], strides = [1, 1]} : vector<40x128xf32> to vector<32x32xf32>
    %4 = vector.extract_strided_slice %1 {offsets = [32, 0], sizes = [1, 32], strides = [1, 1]} : vector<40x128xf32> to vector<1x32xf32>
    %5 = vector.extract_strided_slice %1 {offsets = [32, 32], sizes = [1, 32], strides = [1, 1]} : vector<40x128xf32> to vector<1x32xf32>
    %6 = vector.extract_strided_slice %1 {offsets = [32, 64], sizes = [1, 32], strides = [1, 1]} : vector<40x128xf32> to vector<1x32xf32>
    %7 = vector.extract_strided_slice %1 {offsets = [32, 96], sizes = [1, 32], strides = [1, 1]} : vector<40x128xf32> to vector<1x32xf32>
    %8 = vector.extract_strided_slice %1 {offsets = [33, 0], sizes = [1, 32], strides = [1, 1]} : vector<40x128xf32> to vector<1x32xf32>
    %9 = vector.extract_strided_slice %1 {offsets = [33, 32], sizes = [1, 32], strides = [1, 1]} : vector<40x128xf32> to vector<1x32xf32>
    %cst = arith.constant dense<0.000000e+00> : vector<96x128xf32>
    %10 = tpu.matmul %0, %2, %cst {dimension_numbers = #tpu.dot_dimension_numbers<[1], [0], [0], [1], [0, 0, 1, 1], [], []>} : vector<96x32xf32>, vector<32x128xf32>, vector<96x128xf32> -> vector<96x128xf32>
    %11 = vector.extract_strided_slice %0 {offsets = [0, 0], sizes = [16, 32], strides = [1, 1]} : vector<96x32xf32> to vector<16x32xf32>
    %12 = vector.extract_strided_slice %10 {offsets = [0, 0], sizes = [16, 32], strides = [1, 1]} : vector<96x128xf32> to vector<16x32xf32>
    %13 = vector.extract_strided_slice %10 {offsets = [16, 0], sizes = [16, 32], strides = [1, 1]} : vector<96x128xf32> to vector<16x32xf32>
    %14 = arith.addf %12, %13 : vector<16x32xf32>
    %15 = vector.broadcast %4 : vector<1x32xf32> to vector<16x32xf32>
    %16 = arith.addf %14, %15 : vector<16x32xf32>
    %17 = vector.extract_strided_slice %10 {offsets = [32, 32], sizes = [32, 32], strides = [1, 1]} : vector<96x128xf32> to vector<32x32xf32>
    %18 = vector.extract_strided_slice %10 {offsets = [64, 32], sizes = [32, 32], strides = [1, 1]} : vector<96x128xf32> to vector<32x32xf32>
    %19 = arith.addf %17, %18 : vector<32x32xf32>
    %20 = vector.broadcast %5 : vector<1x32xf32> to vector<32x32xf32>
    %21 = arith.addf %19, %20 : vector<32x32xf32>
    %22 = vector.extract_strided_slice %10 {offsets = [32, 64], sizes = [32, 32], strides = [1, 1]} : vector<96x128xf32> to vector<32x32xf32>
    %23 = vector.broadcast %6 : vector<1x32xf32> to vector<32x32xf32>
    %24 = arith.addf %22, %23 : vector<32x32xf32>
    %25 = vector.extract_strided_slice %16 {offsets = [0, 0], sizes = [16, 8], strides = [1, 1]} : vector<16x32xf32> to vector<16x8xf32>
    %26 = vector.extract_strided_slice %16 {offsets = [0, 8], sizes = [16, 8], strides = [1, 1]} : vector<16x32xf32> to vector<16x8xf32>
    %27 = vector.extract_strided_slice %16 {offsets = [0, 16], sizes = [16, 8], strides = [1, 1]} : vector<16x32xf32> to vector<16x8xf32>
    %28 = vector.extract_strided_slice %16 {offsets = [0, 24], sizes = [16, 8], strides = [1, 1]} : vector<16x32xf32> to vector<16x8xf32>
    %29 = vector.shape_cast %25 : vector<16x8xf32> to vector<1x16x8xf32>
    %30 = vector.shape_cast %26 : vector<16x8xf32> to vector<1x16x8xf32>
    %31 = vector.shape_cast %27 : vector<16x8xf32> to vector<1x16x8xf32>
    %32 = vector.shape_cast %28 : vector<16x8xf32> to vector<1x16x8xf32>
    %33 = tpu.concatenate %29, %30, %31, %32 in 0 : vector<1x16x8xf32>, vector<1x16x8xf32>, vector<1x16x8xf32>, vector<1x16x8xf32> -> vector<4x16x8xf32>
    %34 = vector.extract_strided_slice %21 {offsets = [0, 0], sizes = [32, 8], strides = [1, 1]} : vector<32x32xf32> to vector<32x8xf32>
    %35 = vector.extract_strided_slice %21 {offsets = [0, 8], sizes = [32, 8], strides = [1, 1]} : vector<32x32xf32> to vector<32x8xf32>
    %36 = vector.extract_strided_slice %21 {offsets = [0, 16], sizes = [32, 8], strides = [1, 1]} : vector<32x32xf32> to vector<32x8xf32>
    %37 = vector.extract_strided_slice %21 {offsets = [0, 24], sizes = [32, 8], strides = [1, 1]} : vector<32x32xf32> to vector<32x8xf32>
    %38 = vector.shape_cast %34 : vector<32x8xf32> to vector<1x32x8xf32>
    %39 = vector.shape_cast %35 : vector<32x8xf32> to vector<1x32x8xf32>
    %40 = vector.shape_cast %36 : vector<32x8xf32> to vector<1x32x8xf32>
    %41 = vector.shape_cast %37 : vector<32x8xf32> to vector<1x32x8xf32>
    %42 = tpu.concatenate %38, %39, %40, %41 in 0 : vector<1x32x8xf32>, vector<1x32x8xf32>, vector<1x32x8xf32>, vector<1x32x8xf32> -> vector<4x32x8xf32>
    %43 = vector.extract_strided_slice %24 {offsets = [0, 0], sizes = [32, 8], strides = [1, 1]} : vector<32x32xf32> to vector<32x8xf32>
    %44 = vector.extract_strided_slice %24 {offsets = [0, 8], sizes = [32, 8], strides = [1, 1]} : vector<32x32xf32> to vector<32x8xf32>
    %45 = vector.extract_strided_slice %24 {offsets = [0, 16], sizes = [32, 8], strides = [1, 1]} : vector<32x32xf32> to vector<32x8xf32>
    %46 = vector.extract_strided_slice %24 {offsets = [0, 24], sizes = [32, 8], strides = [1, 1]} : vector<32x32xf32> to vector<32x8xf32>
    %47 = vector.shape_cast %43 : vector<32x8xf32> to vector<1x32x8xf32>
    %48 = vector.shape_cast %44 : vector<32x8xf32> to vector<1x32x8xf32>
    %49 = vector.shape_cast %45 : vector<32x8xf32> to vector<1x32x8xf32>
    %50 = vector.shape_cast %46 : vector<32x8xf32> to vector<1x32x8xf32>
    %51 = tpu.concatenate %47, %48, %49, %50 in 0 : vector<1x32x8xf32>, vector<1x32x8xf32>, vector<1x32x8xf32>, vector<1x32x8xf32> -> vector<4x32x8xf32>
    "tpu.trace_start"() <{level = 10 : i32, message = "hqd,hkd->hqk"}> : () -> ()
    %cst_3 = arith.constant dense<0.000000e+00> : vector<4x16x32xf32>
    %52 = tpu.matmul %33, %42, %cst_3 {dimension_numbers = #tpu.dot_dimension_numbers<[2], [2], [1], [1], [0, 0, 0, 1, 1, 1], [0], [0]>} : vector<4x16x8xf32>, vector<4x32x8xf32>, vector<4x16x32xf32> -> vector<4x16x32xf32>
    "tpu.trace_stop"() : () -> ()
    %cst_4 = arith.constant 0.353553385 : f32
    %53 = vector.broadcast %cst_4 : f32 to vector<4x16x32xf32>
    %54 = arith.mulf %52, %53 : vector<4x16x32xf32>
    %55 = tpu.iota {dimensions = array<i32: 0>} : vector<16x32xi32>
    %56 = tpu.iota {dimensions = array<i32: 1>} : vector<16x32xi32>
    %c1_i32 = arith.constant 1 : i32
    %57 = vector.broadcast %c1_i32 : i32 to vector<16x32xi32>
    %58 = arith.andi %55, %57 : vector<16x32xi32>
    %c1_i32_5 = arith.constant 1 : i32
    %59 = vector.broadcast %c1_i32_5 : i32 to vector<16x32xi32>
    %60 = arith.andi %56, %59 : vector<16x32xi32>
    %61 = arith.cmpi eq, %58, %60 : vector<16x32xi32>
    %cst_6 = arith.constant 0.000000e+00 : f32
    %cst_7 = arith.constant -1.000000e+30 : f32
    %62 = vector.broadcast %cst_6 : f32 to vector<16x32xf32>
    %63 = vector.broadcast %cst_7 : f32 to vector<16x32xf32>
    %64 = arith.select %61, %62, %63 : vector<16x32xi1>, vector<16x32xf32>
    %65 = vector.shape_cast %64 : vector<16x32xf32> to vector<1x16x32xf32>
    %66 = vector.broadcast %65 : vector<1x16x32xf32> to vector<4x16x32xf32>
    %67 = arith.addf %54, %66 : vector<4x16x32xf32>
    %cst_8 = arith.constant dense<0xFF800000> : vector<4x16xf32>
    %68 = vector.multi_reduction <maximumf>, %67, %cst_8 [2] : vector<4x16x32xf32> to vector<4x16xf32>
    %69 = vector.shape_cast %68 : vector<4x16xf32> to vector<4x16x1xf32>
    %70 = vector.broadcast %69 : vector<4x16x1xf32> to vector<4x16x32xf32>
    %71 = arith.subf %67, %70 : vector<4x16x32xf32>
    %72 = math.exp %71 : vector<4x16x32xf32>
    %cst_9 = arith.constant dense<0.000000e+00> : vector<4x16xf32>
    %73 = vector.multi_reduction <add>, %72, %cst_9 [2] : vector<4x16x32xf32> to vector<4x16xf32>
    %74 = vector.shape_cast %73 : vector<4x16xf32> to vector<4x16x1xf32>
    %75 = vector.broadcast %74 : vector<4x16x1xf32> to vector<4x16x32xf32>
    %76 = arith.divf %72, %75 : vector<4x16x32xf32>
    "tpu.trace_start"() <{level = 10 : i32, message = "hqk,hkd->hqd"}> : () -> ()
    %cst_10 = arith.constant dense<0.000000e+00> : vector<4x16x8xf32>
    %77 = tpu.matmul %76, %51, %cst_10 {dimension_numbers = #tpu.dot_dimension_numbers<[2], [1], [1], [2], [0, 0, 0, 1, 1, 2], [0], [0]>} : vector<4x16x32xf32>, vector<4x32x8xf32>, vector<4x16x8xf32> -> vector<4x16x8xf32>
    "tpu.trace_stop"() : () -> ()
    %78 = vector.shape_cast %3 : vector<32x32xf32> to vector<4x8x32xf32>
    "tpu.trace_start"() <{level = 10 : i32, message = "hqd,hdm->hqm"}> : () -> ()
    %cst_11 = arith.constant dense<0.000000e+00> : vector<4x16x32xf32>
    %79 = tpu.matmul %77, %78, %cst_11 {dimension_numbers = #tpu.dot_dimension_numbers<[2], [1], [1], [2], [0, 0, 0, 1, 1, 2], [0], [0]>} : vector<4x16x8xf32>, vector<4x8x32xf32>, vector<4x16x32xf32> -> vector<4x16x32xf32>
    "tpu.trace_stop"() : () -> ()
    %cst_12 = arith.constant dense<0.000000e+00> : vector<16x32xf32>
    %80 = vector.multi_reduction <add>, %79, %cst_12 [0] : vector<4x16x32xf32> to vector<16x32xf32>
    %81 = vector.broadcast %7 : vector<1x32xf32> to vector<16x32xf32>
    %82 = arith.addf %80, %81 : vector<16x32xf32>
    %83 = arith.addf %11, %82 : vector<16x32xf32>
    %cst_13 = arith.constant dense<0.000000e+00> : vector<16xf32>
    %84 = vector.multi_reduction <add>, %83, %cst_13 [1] : vector<16x32xf32> to vector<16xf32>
    %85 = vector.shape_cast %84 : vector<16xf32> to vector<16x1xf32>
    %cst_14 = arith.constant 3.200000e+01 : f32
    %86 = vector.broadcast %cst_14 : f32 to vector<16x1xf32>
    %87 = arith.divf %85, %86 : vector<16x1xf32>
    %88 = vector.broadcast %87 : vector<16x1xf32> to vector<16x32xf32>
    %89 = arith.subf %83, %88 : vector<16x32xf32>
    %90 = arith.mulf %89, %89 : vector<16x32xf32>
    %cst_15 = arith.constant dense<0.000000e+00> : vector<16xf32>
    %91 = vector.multi_reduction <add>, %90, %cst_15 [1] : vector<16x32xf32> to vector<16xf32>
    %92 = vector.shape_cast %91 : vector<16xf32> to vector<16x1xf32>
    %cst_16 = arith.constant 3.200000e+01 : f32
    %93 = vector.broadcast %cst_16 : f32 to vector<16x1xf32>
    %94 = arith.divf %92, %93 : vector<16x1xf32>
    %cst_17 = arith.constant 9.99999974E-6 : f32
    %95 = vector.broadcast %cst_17 : f32 to vector<16x1xf32>
    %96 = arith.addf %94, %95 : vector<16x1xf32>
    %97 = math.rsqrt %96 : vector<16x1xf32>
    %98 = vector.broadcast %97 : vector<16x1xf32> to vector<16x32xf32>
    %99 = arith.mulf %89, %98 : vector<16x32xf32>
    %100 = vector.broadcast %8 : vector<1x32xf32> to vector<16x32xf32>
    %101 = arith.mulf %99, %100 : vector<16x32xf32>
    %102 = vector.broadcast %9 : vector<1x32xf32> to vector<16x32xf32>
    %103 = arith.addf %101, %102 : vector<16x32xf32>
    %c0_18 = arith.constant 0 : index
    %c0_19 = arith.constant 0 : index
    %104 = vector.load %arg2[%c0_18, %c0_19] : memref<16x32xf32, #tpu.memory_space<vmem>>, vector<16x32xf32>
    tpu.vector_store %arg2[%c0_18, %c0_19], %103 {strides = array<i32>} : memref<16x32xf32, #tpu.memory_space<vmem>>, vector<16x32xf32>,
    return
  }
}

</mosaic_0001>

<bundles_post_ra>
// kernel: dm_layer_forward.1
= control target key start
LH: loop header
LB: loop body
LE: loop exit
PB: predicated region body
PF: predicated region fallthrough
CT: control target
= control target key end

     0   :  { %s1665_s0 = inlined_call_operand.vmem [shape: f32[96,32], index: 0, kind: input, shape index: {}]   ;;  %s1666_s1 = inlined_call_operand.vmem [shape: f32[40,128], index: 1, kind: input, shape index: {}]   ;;  %s1667_s2 = inlined_call_operand.hbm [shape: f32[16,32], index: 2, kind: output, shape index: {}]  }
   0x1   :  { %v1235_v0 = vld [vmem:[%s1666_s1 + $0x18] sm:$0xff]  ;;  %v1240_v1 = vld [vmem:[%s1666_s1 + $0x10] sm:$0xff]  ;;  %v1247_v2 = vld [vmem:[%s1666_s1 + $0x8] sm:$0xff] }
   0x2   :  { %78 = vmatpush.msra.mxu0 %v1235_v0  ;;  %1049 = vmatpush.msra.mxu1 %v1235_v0 }
   0x4   :  { %79 = vmatpush.msra.mxu0 %v1240_v1  ;;  %1050 = vmatpush.msra.mxu1 %v1240_v1 }
   0x5   :  { %7 = vsyncpa [#allocation3], 0  ;;  %v1254_v3 = vld [vmem:[%s1666_s1] sm:$0xff]  ;;  %vm29_vm0 = vcmask 261120   ;;  %v13_v5 = vld [vmem:[%s1665_s0 + $0x8] sm:$0xff]  ;;  %s1206_s15 = smov 104  }
   0x6   :  { %80 = vmatpush.msra.mxu0 %v1247_v2  ;;  %v12_v4 = vld [vmem:[%s1665_s0] sm:$0xff]  ;;  %1051 = vmatpush.msra.mxu1 %v1247_v2  ;;  %v14_v6 = vld [vmem:[%s1665_s0 + $0x10] sm:$0xff]  ;;  %v15_v8 = vld [vmem:[%s1665_s0 + $0x18] sm:$0xff]  ;;  %s1207_s16 = smov 112   ;;  %s1208_s17 = smov 120   ;;  %vm214_vm1 = vcmask 64512  }
   0x7   :  { %v22_v7 = vld [vmem:[%s1665_s0 + $0x50] sm:$0xff]  ;;  %v23_v9 = vld [vmem:[%s1665_s0 + $0x58] sm:$0xff]  ;;  %v16_v10 = vld [vmem:[%s1665_s0 + $0x20] sm:$0xff]  ;;  %s1209_s18 = smov 96   ;;  %s1210_s19 = smov 64  }
   0x8   :  { %81 = vmatpush.msra.mxu0 %v1254_v3  ;;  %1052 = vmatpush.msra.mxu1 %v1254_v3  ;;  %v17_v11 = vld [vmem:[%s1665_s0 + $0x28] sm:$0xff]  ;;  %v18_v12 = vld [vmem:[%s1665_s0 + $0x30] sm:$0xff]  ;;  %v19_v13 = vld [vmem:[%s1665_s0 + $0x38] sm:$0xff]  ;;  %s1212_s20 = smov 32   ;;  %s985_s29 = sshll.u32 %s1667_s2, 4  ;;  %s986_s29 = int_to_ptr.hbm [resolvable:$true] %s985_s29 }
   0x9   :  { %997 = vmatmul.msk.f32.vlgmr.msra.gmra.mxu0 %vm29_vm0, %v12_v4  ;;  %1007 = vmatmul.msk.f32.vlgmr.msra.gmra.mxu1 %vm29_vm0, %v22_v7  ;;  %v20_v14 = vld [vmem:[%s1665_s0 + $0x40] sm:$0xff]  ;;  %v21_v15 = vld [vmem:[%s1665_s0 + $0x48] sm:$0xff]  ;;  %s1215_s30 = smov 128   ;;  %s1216_s3 = smov 8  }
   0xa   :  { %v28_v23 = vld [vmem:[%s1666_s1 + $0x20] sm:$0xff] }
   0xb   :  { %v1315_v24 = vperm.slane %v28_v23, 0 }
  0x11   :  { %998 = vmatmul.msk.f32.gmra.mxu0 %vm29_vm0, %v13_v5  ;;  %1008 = vmatmul.msk.f32.gmra.mxu1 %vm29_vm0, %v23_v9 }
  0x19   :  { %999 = vmatmul.msk.f32.gmra.mxu0 %vm29_vm0, %v14_v6 }
  0x21   :  { %1000 = vmatmul.msk.f32.gmra.mxu0 %vm29_vm0, %v15_v8 }
  0x29   :  { %1001 = vmatmul.msk.f32.gmra.mxu0 %vm29_vm0, %v16_v10 }
  0x31   :  { %1002 = vmatmul.msk.f32.gmra.mxu0 %vm29_vm0, %v17_v11 }
  0x39   :  { %1003 = vmatmul.msk.f32.gmra.mxu0 %vm29_vm0, %v18_v12 }
  0x41   :  { %1004 = vmatmul.msk.f32.gmra.mxu0 %vm29_vm0, %v19_v13 }
  0x49   :  { %1005 = vmatmul.msk.f32.gmra.mxu0 %vm29_vm0, %v20_v14 }
  0x51   :  { %1006 = vmatmul.msk.f32.gmra.mxu0 %vm29_vm0, %v21_v15 }
  0x86   :  { %v83_v16 = vpop.f32.mrf.mxu0  ;;  %v113_v29 = vpop.f32.mrf.mxu1 }
  0x8e   :  { %v86_v17 = vpop.f32.mrf.mxu0  ;;  %v116_v33 = vpop.f32.mrf.mxu1 }
  0x96   :  { %v89_v18 = vpop.f32.mrf.mxu0 }
  0x97   :  { %v1308_v19 = vadd.f32 %v89_v18, %v83_v16 }
  0x99   :  { %v122_v56 = vadd.f32 %v1315_v24, %v1308_v19 }
  0x9e   :  { %v92_v20 = vpop.f32.mrf.mxu0 }
  0x9f   :  { %v1310_v21 = vadd.f32 %v92_v20, %v86_v17  ;;  %v387_v20 = vlaneseq }
  0xa1   :  { %v123_v62 = vadd.f32 %v1315_v24, %v1310_v21  ;;  %v391_v23 = vand.u32 127, %v387_v20 }
  0xa6   :  { %v95_v22 = vpop.f32.mrf.mxu0 }
  0xa7   :  { %v132_v26 = vadd.f32 %v1315_v24, %v95_v22 }
  0xae   :  { %v98_v25 = vpop.f32.mrf.mxu0 }
  0xaf   :  { %v133_v27 = vadd.f32 %v1315_v24, %v98_v25 }
  0xb1   :  { %v1319_v28 = vpack.i.bf16 %v132_v26, %v133_v27 }
  0xb6   :  { %v101_v30 = vpop.f32.mrf.mxu0 }
  0xb7   :  { %v126_v31 = vadd.f32 %v113_v29, %v101_v30  ;;  %v134_v35 = vadd.f32 %v1315_v24, %v101_v30  ;;  %v394_v29 = vand.u32 1, %v391_v23 }
  0xb9   :  { %v130_v32 = vadd.f32 %v126_v31, %v1315_v24 }
  0xbb   :  { %174 = vrot.lane.b32.xlu0 %v130_v32, %s1206_s15  ;;  %166 = vrot.lane.b32.xlu2 %v130_v32, %s1207_s16 }
  0xbc   :  { %158 = vrot.lane.b32.xlu1 %v130_v32, %s1208_s17 }
  0xbe   :  { %v104_v34 = vpop.f32.mrf.mxu0 }
  0xbf   :  { %v135_v36 = vadd.f32 %v1315_v24, %v104_v34  ;;  %v127_v37 = vadd.f32 %v116_v33, %v104_v34 }
  0xc1   :  { %v131_v38 = vadd.f32 %v127_v37, %v1315_v24  ;;  %v1328_v39 = vpack.i.bf16 %v134_v35, %v135_v36  ;;  %v1211_v36 = vmov -1e+30  }
  0xc3   :  { %160 = vrot.lane.b32.xlu0 %v131_v38, %s1208_s17 }
  0xc4   :  { %176 = vrot.lane.b32.xlu1 %v131_v38, %s1206_s15 }
  0xc6   :  { %v107_v40 = vpop.f32.mrf.mxu0 }
  0xc7   :  { %v124_v41 = vadd.f32 %v107_v40, %v95_v22  ;;  %v388_v22 = vshrl.u32 %v387_v20, 7 }
  0xc9   :  { %v128_v42 = vadd.f32 %v124_v41, %v1315_v24  ;;  %v392_v27 = vand.u32 1, %v388_v22  ;;  %v389_v34 = vadd.s32 8, %v388_v22 }
  0xcb   :  { %168 = vrot.lane.b32.xlu0 %v131_v38, %s1207_s16  ;;  %154 = vrot.lane.b32.xlu2 %v128_v42, %s1208_s17  ;;  %vm395_vm2 = vcmp.eq.s32.totalorder %v392_v27, %v394_v29  ;;  %v393_v40 = vand.u32 1, %v389_v34 }
  0xcc   :  { %162 = vrot.lane.b32.xlu1 %v128_v42, %s1207_s16  ;;  %v397_v37 = vsel %vm395_vm2, 0.0, %v1211_v36 }
  0xcd   :  { %vm396_vm3 = vcmp.eq.s32.totalorder %v393_v40, %v394_v29 }
  0xce   :  { %v110_v43 = vpop.f32.mrf.mxu0 }
  0xcf   :  { %v125_v44 = vadd.f32 %v110_v43, %v98_v25 }
  0xd1   :  { %v129_v45 = vadd.f32 %v125_v44, %v1315_v24  ;;  %v398_v44 = vsel %vm396_vm3, 0.0, %v1211_v36 }
  0xd3   :  { %212 = vrot.lane.b32.xlu0 %v131_v38, %s1209_s18  ;;  %170 = vrot.lane.b32.xlu2 %v128_v42, %s1206_s15 }
  0xd4   :  { %164 = vrot.lane.b32.xlu1 %v129_v45, %s1207_s16 }
  0xdb   :  { %172 = vrot.lane.b32.xlu0 %v129_v45, %s1206_s15  ;;  %156 = vrot.lane.b32.xlu2 %v129_v45, %s1208_s17 }
  0xdc   :  { %210 = vrot.lane.b32.xlu1 %v130_v32, %s1209_s18 }
  0xe3   :  { %206 = vrot.lane.b32.xlu0 %v128_v42, %s1209_s18  ;;  %208 = vrot.lane.b32.xlu2 %v129_v45, %s1209_s18 }
 0x115   :  { %v167_v46 = vpop.permute.xlu2 %166 }
 0x116   :  { %297 = vrot.lane.b32.xlu2 %v167_v46, %s1209_s18 }
 0x125   :  { %v155_v47 = vpop.permute.xlu2 %154 }
 0x12d   :  { %v175_v48 = vpop.permute.xlu0 %174  ;;  %v171_v50 = vpop.permute.xlu2 %170 }
 0x12e   :  { %v159_v49 = vpop.permute.xlu1 %158  ;;  %340 = vrot.lane.b32.xlu1 %v175_v48, %s1209_s18 }
 0x12f   :  { %254 = vrot.lane.b32.xlu0 %v159_v49, %s1209_s18 }
 0x135   :  { %v161_v51 = vpop.permute.xlu0 %160  ;;  %v157_v54 = vpop.permute.xlu2 %156 }
 0x136   :  { %v177_v52 = vpop.permute.xlu1 %176  ;;  %256 = vrot.lane.b32.xlu1 %v161_v51, %s1209_s18 }
 0x137   :  { %250 = vrot.lane.b32.xlu0 %v155_v47, %s1209_s18 }
 0x13d   :  { %v169_v53 = vpop.permute.xlu0 %168  ;;  %v209_v61 = vpop.permute.xlu2 %208 }
 0x13e   :  { %v163_v55 = vpop.permute.xlu1 %162  ;;  %342 = vrot.lane.b32.xlu1 %v177_v52, %s1209_s18  ;;  %299 = vrot.lane.b32.xlu2 %v169_v53, %s1209_s18 }
 0x13f   :  { %252 = vrot.lane.b32.xlu0 %v157_v54, %s1209_s18 }
 0x145   :  { %v213_v57 = vpop.permute.xlu0 %212 }
 0x146   :  { %v165_v58 = vpop.permute.xlu1 %164  ;;  %1009 = vmatpush.xpose.msk.msrb.mxu1 %vm214_vm1, %v213_v57  ;;  %293 = vrot.lane.b32.xlu2 %v163_v55, %s1209_s18 }
 0x147   :  { %138 = vrot.lane.b32.xlu0 %v122_v56, %s1208_s17 }
 0x14d   :  { %v173_v59 = vpop.permute.xlu0 %172 }
 0x14e   :  { %v211_v60 = vpop.permute.xlu1 %210  ;;  %338 = vrot.lane.b32.xlu1 %v173_v59, %s1209_s18  ;;  %295 = vrot.lane.b32.xlu2 %v165_v58, %s1209_s18 }
 0x14f   :  { %1010 = vmatpush.xpose.msk.msrb.mxu1 %vm214_vm1, %v211_v60  ;;  %146 = vrot.lane.b32.xlu0 %v122_v56, %s1206_s15 }
 0x153   :  { %1011 = vmatpush.xpose.msk.msrb.mxu1 %vm214_vm1, %v209_v61 }
 0x155   :  { %v207_v63 = vpop.permute.xlu0 %206 }
 0x156   :  { %336 = vrot.lane.b32.xlu1 %v171_v50, %s1209_s18  ;;  %142 = vrot.lane.b32.xlu2 %v122_v56, %s1207_s16 }
 0x157   :  { %148 = vrot.lane.b32.xlu0 %v123_v62, %s1206_s15  ;;  %1012 = vmatpush.xpose.msk.msrb.mxu1 %vm214_vm1, %v207_v63 }
 0x15a   :  { %1013 = vmatmul.msk.f32.vlgmr.msrb.gmra.mxu1 %vm214_vm1, %v122_v56 }
 0x15e   :  { %140 = vrot.lane.b32.xlu1 %v123_v62, %s1208_s17  ;;  %144 = vrot.lane.b32.xlu2 %v123_v62, %s1207_s16 }
 0x15f   :  { %1070 = vrot.lane.b32.xlu0 %v1328_v39, %s1208_s17 }
 0x162   :  { %1014 = vmatmul.msk.f32.gmra.mxu1 %vm214_vm1, %v123_v62 }
 0x166   :  { %1075 = vrot.lane.b32.xlu1 %v1328_v39, %s1207_s16  ;;  %1065 = vrot.lane.b32.xlu2 %v1328_v39, %s1206_s15 }
 0x167   :  { %1080 = vrot.lane.b32.xlu0 %v1319_v28, %s1206_s15 }
 0x16e   :  { %1090 = vrot.lane.b32.xlu1 %v1319_v28, %s1207_s16  ;;  %1085 = vrot.lane.b32.xlu2 %v1319_v28, %s1208_s17 }
 0x170   :  { %v298_v4 = vpop.permute.xlu2 %297 }
 0x176   :  { %1095 = vrot.lane.b32.xlu1 %v1328_v39, %s1210_s19 }
 0x198   :  { %v300_v5 = vpop.permute.xlu2 %299 }
 0x199   :  { %1021 = vmatpush.xpose.msk.msra.mxu3 %vm214_vm1, %v300_v5 }
 0x19d   :  { %1022 = vmatpush.xpose.msk.msra.mxu3 %vm214_vm1, %v298_v4 }
 0x1a0   :  { %v341_v6 = vpop.permute.xlu1 %340  ;;  %v294_v7 = vpop.permute.xlu2 %293 }
 0x1a1   :  { %v255_v8 = vpop.permute.xlu0 %254 }
 0x1a8   :  { %v257_v9 = vpop.permute.xlu1 %256  ;;  %v296_v10 = vpop.permute.xlu2 %295 }
 0x1a9   :  { %v251_v11 = vpop.permute.xlu0 %250  ;;  %1015 = vmatpush.xpose.msk.msra.mxu2 %vm214_vm1, %v257_v9  ;;  %1023 = vmatpush.xpose.msk.msra.mxu3 %vm214_vm1, %v296_v10 }
 0x1ad   :  { %1016 = vmatpush.xpose.msk.msra.mxu2 %vm214_vm1, %v255_v8  ;;  %1024 = vmatpush.xpose.msk.msra.mxu3 %vm214_vm1, %v294_v7 }
 0x1b0   :  { %v343_v12 = vpop.permute.xlu1 %342  ;;  %v143_v13 = vpop.permute.xlu2 %142 }
 0x1b1   :  { %v253_v14 = vpop.permute.xlu0 %252  ;;  %1025 = vmatmul.msk.f32.vlgmr.msra.gmra.mxu3 %vm214_vm1, %v143_v13  ;;  %1027 = vmatpush.xpose.msk.msra.mxu1 %vm214_vm1, %v343_v12 }
 0x1b2   :  { %1017 = vmatpush.xpose.msk.msra.mxu2 %vm214_vm1, %v253_v14 }
 0x1b5   :  { %1028 = vmatpush.xpose.msk.msra.mxu1 %vm214_vm1, %v341_v6 }
 0x1b6   :  { %1018 = vmatpush.xpose.msk.msra.mxu2 %vm214_vm1, %v251_v11 }
 0x1b8   :  { %v145_v15 = vpop.permute.xlu2 %144 }
 0x1b9   :  { %v139_v16 = vpop.permute.xlu0 %138  ;;  %1026 = vmatmul.msk.f32.gmra.mxu3 %vm214_vm1, %v145_v15 }
 0x1ba   :  { %1019 = vmatmul.msk.f32.vlgmr.msra.gmra.mxu2 %vm214_vm1, %v139_v16 }
 0x1c0   :  { %v339_v17 = vpop.permute.xlu1 %338  ;;  %v1403_v25 = vpop.permute.xlu2 %1065 }
 0x1c1   :  { %v147_v18 = vpop.permute.xlu0 %146  ;;  %1029 = vmatpush.xpose.msk.msra.mxu1 %vm214_vm1, %v339_v17  ;;  %v1068_v31 = vunpack.i.h.bf16 %v1403_v25 }
 0x1c8   :  { %v337_v19 = vpop.permute.xlu1 %336  ;;  %v1423_v8 = vpop.permute.xlu2 %1085 }
 0x1c9   :  { %v149_v21 = vpop.permute.xlu0 %148  ;;  %1030 = vmatpush.xpose.msk.msra.mxu1 %vm214_vm1, %v337_v19 }
 0x1cc   :  { %1031 = vmatmul.msk.f32.vlgmr.msra.gmra.mxu1 %vm214_vm1, %v147_v18 }
 0x1d0   :  { %v141_v26 = vpop.permute.xlu1 %140 }
 0x1d1   :  { %v1405_v30 = vpop.permute.xlu0 %1070  ;;  %1020 = vmatmul.msk.f32.gmra.mxu2 %vm214_vm1, %v141_v26 }
 0x1d2   :  { %v1073_v32 = vunpack.i.h.bf16 %v1405_v30 }
 0x1d4   :  { %v1410_v33 = vpack.i.bf16 %v1073_v32, %v1068_v31  ;;  %1032 = vmatmul.msk.f32.gmra.mxu1 %vm214_vm1, %v149_v21 }
 0x1d7   :  { %v244_v35 = vpop.f32.mrf.mxu1 }
 0x1d8   :  { %v379_v38 = vmul.f32 0.35355338, %v244_v35  ;;  %v1413_v39 = vpop.permute.xlu1 %1075 }
 0x1da   :  { %v399_v41 = vadd.f32 %v397_v37, %v379_v38 }
 0x1dc   :  { %v407_v42 = vsel %vm29_vm0, %v399_v41, -inf }
 0x1dd   :  { %408 = vmax.xlane.f32.xlu1 %v407_v42 }
 0x1df   :  { %v247_v43 = vpop.f32.mrf.mxu1 }
 0x1e0   :  { %v380_v45 = vmul.f32 0.35355338, %v247_v43  ;;  %v1416_v46 = vpop.permute.xlu1 %1090 }
 0x1e2   :  { %v400_v47 = vadd.f32 %v398_v44, %v380_v45 }
 0x1e4   :  { %v410_v48 = vsel %vm29_vm0, %v400_v47, -inf }
 0x1e5   :  { %411 = vmax.xlane.f32.xlu2 %v410_v48 }
 0x1e8   :  { %v1096_v49 = vpop.permute.xlu1 %1095 }
 0x1e9   :  { %v1097_v50 = vunpack.i.l.bf16 %v1096_v49  ;;  %v1098_v51 = vunpack.i.h.bf16 %v1096_v49 }
 0x1eb   :  { %629 = vmatpush.msrb.mxu2 %v1097_v50 }
 0x1ed   :  { %630 = vmatpush.msrb.mxu2 %v1098_v51 }
 0x234   :  { %v330_v52 = vpop.f32.mrf.mxu3 }
 0x235   :  { %v383_v53 = vmul.f32 0.35355338, %v330_v52 }
 0x237   :  { %v403_v54 = vadd.f32 %v397_v37, %v383_v53 }
 0x239   :  { %v419_v55 = vsel %vm29_vm0, %v403_v54, -inf }
 0x23a   :  { %420 = vmax.xlane.f32.xlu1 %v419_v55 }
 0x23c   :  { %v333_v56 = vpop.f32.mrf.mxu3 }
 0x23d   :  { %v287_v57 = vpop.f32.mrf.mxu2  ;;  %v384_v58 = vmul.f32 0.35355338, %v333_v56 }
 0x23e   :  { %v381_v59 = vmul.f32 0.35355338, %v287_v57 }
 0x23f   :  { %v404_v60 = vadd.f32 %v398_v44, %v384_v58 }
 0x240   :  { %v401_v61 = vadd.f32 %v397_v37, %v381_v59 }
 0x241   :  { %v422_v62 = vsel %vm29_vm0, %v404_v60, -inf }
 0x242   :  { %v413_v63 = vsel %vm29_vm0, %v401_v61, -inf  ;;  %423 = vmax.xlane.f32.xlu1 %v422_v62 }
 0x243   :  { %414 = vmax.xlane.f32.xlu2 %v413_v63 }
 0x249   :  { %v373_v4 = vpop.f32.mrf.mxu1 }
 0x24a   :  { %v385_v5 = vmul.f32 0.35355338, %v373_v4 }
 0x24c   :  { %v405_v6 = vadd.f32 %v397_v37, %v385_v5 }
 0x24e   :  { %v425_v7 = vsel %vm29_vm0, %v405_v6, -inf }
 0x24f   :  { %426 = vmax.xlane.f32.xlu0 %v425_v7 }
 0x250   :  { %v409_v9 = vpop.xlane.xlu1 %408 }
 0x251   :  { %v431_v10 = vsub.f32 %v399_v41, %v409_v9  ;;  %v376_v11 = vpop.f32.mrf.mxu1  ;;  %v1437_v41 = vpop.permute.xlu0 %1080 }
 0x252   :  { %v386_v12 = vmul.f32 0.35355338, %v376_v11 }
 0x253   :  { %v439_v13 = vmul.f32 1.442695, %v431_v10 }
 0x254   :  { %v406_v14 = vadd.f32 %v398_v44, %v386_v12  ;;  %v290_v17 = vpop.f32.mrf.mxu2 }
 0x255   :  { %1139 = vpow2.f32 %v439_v13  ;;  %v382_v21 = vmul.f32 0.35355338, %v290_v17 }
 0x256   :  { %v428_v15 = vsel %vm29_vm0, %v406_v14, -inf }
 0x257   :  { %429 = vmax.xlane.f32.xlu2 %v428_v15  ;;  %v402_v23 = vadd.f32 %v398_v44, %v382_v21 }
 0x258   :  { %v412_v16 = vpop.xlane.xlu2 %411 }
 0x259   :  { %v432_v18 = vsub.f32 %v400_v47, %v412_v16  ;;  %v416_v27 = vsel %vm29_vm0, %v402_v23, -inf }
 0x25b   :  { %v1426_v19 = vpop.eup %1139  ;;  %v441_v20 = vmul.f32 1.442695, %v432_v18  ;;  %v1072_v18 = vunpack.i.l.bf16 %v1405_v30 }
 0x25c   :  { %v455_v22 = vsel %vm29_vm0, %v1426_v19, 0.0 }
 0x25d   :  { %1141 = vpow2.f32 %v441_v20  ;;  %456 = vadd.xlane.f32.xlu0 %v455_v22  ;;  %v1067_v22 = vunpack.i.l.bf16 %v1403_v25  ;;  %v1077_v25 = vunpack.i.l.bf16 %v1413_v39 }
 0x263   :  { %v1430_v26 = vpop.eup %1141 }
 0x264   :  { %v458_v29 = vsel %vm29_vm0, %v1430_v26, 0.0 }
 0x265   :  { %417 = vmax.xlane.f32.xlu0 %v416_v27  ;;  %459 = vadd.xlane.f32.xlu2 %v458_v29 }
 0x279   :  { %1100 = vrot.lane.b32.xlu0 %v1319_v28, %s1210_s19 }
 0x2ad   :  { %v421_v31 = vpop.xlane.xlu1 %420 }
 0x2ae   :  { %v435_v38 = vsub.f32 %v403_v54, %v421_v31  ;;  %v1104_v31 = vpack.i.bf16 %v1072_v18, %v1067_v22 }
 0x2b0   :  { %v447_v42 = vmul.f32 1.442695, %v435_v38 }
 0x2b5   :  { %v424_v32 = vpop.xlane.xlu1 %423 }
 0x2b6   :  { %v436_v34 = vsub.f32 %v404_v60, %v424_v32  ;;  %v415_v35 = vpop.xlane.xlu2 %414 }
 0x2b7   :  { %v433_v36 = vsub.f32 %v401_v61, %v415_v35 }
 0x2b8   :  { %v449_v37 = vmul.f32 1.442695, %v436_v34 }
 0x2b9   :  { %v443_v40 = vmul.f32 1.442695, %v433_v36 }
 0x2ba   :  { %1143 = vpow2.f32 %v449_v37  ;;  %v1082_v37 = vunpack.i.l.bf16 %v1437_v41 }
 0x2bb   :  { %1145 = vpow2.f32 %v443_v40 }
 0x2bc   :  { %1147 = vpow2.f32 %v447_v42  ;;  %v1114_v42 = vpack.i.bf16 %v1082_v37, %v1077_v25 }
 0x2c0   :  { %v1439_v43 = vpop.eup %1143 }
 0x2c1   :  { %v1441_v44 = vpop.eup %1145  ;;  %v470_v28 = vsel %vm29_vm0, %v1439_v43, 0.0 }
 0x2c2   :  { %v427_v45 = vpop.xlane.xlu0 %426  ;;  %471 = vadd.xlane.f32.xlu0 %v470_v28  ;;  %v461_v47 = vsel %vm29_vm0, %v1441_v44, 0.0  ;;  %v1447_v50 = vpop.eup %1147 }
 0x2c3   :  { %v437_v48 = vsub.f32 %v405_v6, %v427_v45  ;;  %462 = vadd.xlane.f32.xlu2 %v461_v47  ;;  %v467_v51 = vsel %vm29_vm0, %v1447_v50, 0.0  ;;  %v1088_v45 = vunpack.i.h.bf16 %v1423_v8 }
 0x2c5   :  { %v451_v49 = vmul.f32 1.442695, %v437_v48  ;;  %v1078_v48 = vunpack.i.h.bf16 %v1413_v39  ;;  %v1134_v39 = vpack.i.bf16 %v1235_v0, %v1240_v1 }
 0x2c7   :  { %1149 = vpow2.f32 %v451_v49  ;;  %v1087_v49 = vunpack.i.l.bf16 %v1423_v8 }
 0x2ca   :  { %v430_v52 = vpop.xlane.xlu2 %429 }
 0x2cb   :  { %468 = vadd.xlane.f32.xlu2 %v467_v51  ;;  %v438_v53 = vsub.f32 %v406_v14, %v430_v52  ;;  %v1119_v51 = vpack.i.bf16 %v1078_v48, %v1087_v49 }
 0x2cd   :  { %v1451_v54 = vpop.eup %1149  ;;  %v453_v55 = vmul.f32 1.442695, %v438_v53 }
 0x2ce   :  { %v473_v56 = vsel %vm29_vm0, %v1451_v54, 0.0 }
 0x2cf   :  { %1151 = vpow2.f32 %v453_v55  ;;  %474 = vadd.xlane.f32.xlu1 %v473_v56 }
 0x2d0   :  { %v457_v57 = vpop.xlane.xlu0 %456 }
 0x2d1   :  { %1153 = vrcp.f32 %v457_v57  ;;  %v490_v14 = vand.u32 2147483648, %v457_v57  ;;  %vm484_vm5 = vweird.f32 %v457_v57  ;;  %v488_v15 = vand.u32 2147483647, %v457_v57 }
 0x2d3   :  { %v491_v20 = vor.u32 1.1754944e-38, %v490_v14  ;;  %vm489_vm7 = vcmp.eq.f32.partialorder %v488_v15, 8.507059e+37 }
 0x2d5   :  { %v1455_v58 = vpop.eup %1151 }
 0x2d6   :  { %v476_v59 = vsel %vm29_vm0, %v1455_v58, 0.0  ;;  %764 = vrot.lane.b32.xlu0 %v1254_v3, %s1212_s20 }
 0x2d7   :  { %v1154_v60 = vpop.eup %1153  ;;  %477 = vadd.xlane.f32.xlu1 %v476_v59 }
 0x2d8   :  { %v418_v61 = vpop.xlane.xlu0 %417  ;;  %v460_v62 = vpop.xlane.xlu2 %459  ;;  %v480_v63 = vmul.f32 %v1154_v60, %v457_v57  ;;  %vm485_vm4 = vweird.f32 %v1154_v60 }
 0x2d9   :  { %v434_v4 = vsub.f32 %v402_v23, %v418_v61  ;;  %1155 = vrcp.f32 %v460_v62  ;;  %vm486_vm6 = vmor %vm484_vm5, %vm485_vm4  ;;  %v505_v32 = vand.u32 2147483648, %v460_v62  ;;  %vm499_vm9 = vweird.f32 %v460_v62 }
 0x2da   :  { %v481_v6 = vsub.f32 1.0, %v480_v63  ;;  %v503_v36 = vand.u32 2147483647, %v460_v62 }
 0x2db   :  { %v445_v5 = vmul.f32 1.442695, %v434_v4  ;;  %v506_v38 = vor.u32 1.1754944e-38, %v505_v32 }
 0x2dc   :  { %v482_v9 = vmul.f32 %v1154_v60, %v481_v6  ;;  %vm504_vm11 = vcmp.eq.f32.partialorder %v503_v36, 8.507059e+37 }
 0x2dd   :  { %1157 = vpow2.f32 %v445_v5 }
 0x2de   :  { %v483_v13 = vadd.f32 %v1154_v60, %v482_v9 }
 0x2df   :  { %v1156_v7 = vpop.eup %1155 }
 0x2e0   :  { %v495_v10 = vmul.f32 %v1156_v7, %v460_v62  ;;  %v487_v17 = vsel %vm486_vm6, %v1154_v60, %v483_v13  ;;  %vm500_vm8 = vweird.f32 %v1156_v7 }
 0x2e1   :  { %v492_v27 = vsel %vm489_vm7, %v491_v20, %v487_v17  ;;  %vm501_vm10 = vmor %vm499_vm9, %vm500_vm8 }
 0x2e2   :  { %v496_v3 = vsub.f32 1.0, %v495_v10  ;;  %v493_v35 = vmul.f32 %v1426_v19, %v492_v27  ;;  %v1083_v19 = vunpack.i.h.bf16 %v1437_v41 }
 0x2e3   :  { %v1461_v11 = vpop.eup %1157 }
 0x2e4   :  { %v464_v12 = vsel %vm29_vm0, %v1461_v11, 0.0  ;;  %v497_v16 = vmul.f32 %v1156_v7, %v496_v3  ;;  %v1124_v47 = vpack.i.bf16 %v1088_v45, %v1083_v19 }
 0x2e5   :  { %465 = vadd.xlane.f32.xlu2 %v464_v12 }
 0x2e6   :  { %v498_v29 = vadd.f32 %v1156_v7, %v497_v16 }
 0x2e8   :  { %v502_v30 = vsel %vm501_vm10, %v1156_v7, %v498_v29 }
 0x2e9   :  { %v507_v40 = vsel %vm504_vm11, %v506_v38, %v502_v30 }
 0x2ea   :  { %v508_v28 = vmul.f32 %v1430_v26, %v507_v40 }
 0x2eb   :  { %v1101_v21 = vpop.permute.xlu0 %1100 }
 0x2ec   :  { %v1102_v23 = vunpack.i.l.bf16 %v1101_v21  ;;  %v1103_v34 = vunpack.i.h.bf16 %v1101_v21 }
 0x2ee   :  { %631 = vmatpush.msrb.mxu2 %v1102_v23 }
 0x2f0   :  { %632 = vmatpush.msrb.mxu2 %v1103_v34  ;;  %1105 = vrot.lane.b32.xlu1 %v1104_v31, %s1210_s19 }
 0x2f1   :  { %1033 = vmatmul.msk.f32.vlgmr.msrb.gmra.mxu2 %vm29_vm0, %v493_v35 }
 0x2f8   :  { %1115 = vrot.lane.b32.xlu1 %v1114_v42, %s1210_s19 }
 0x2f9   :  { %1034 = vmatmul.msk.f32.gmra.mxu2 %vm29_vm0, %v508_v28 }
 0x2fd   :  { %1110 = vrot.lane.b32.xlu2 %v1410_v33, %s1210_s19 }
 0x300   :  { %1125 = vrot.lane.b32.xlu1 %v1124_v47, %s1210_s19 }
 0x305   :  { %1120 = vrot.lane.b32.xlu2 %v1119_v51, %s1210_s19 }
 0x308   :  { %1135 = vrot.lane.b32.xlu1 %v1134_v39, %s1212_s20 }
 0x30d   :  { %1130 = vrot.lane.b32.xlu2 %v1416_v46, %s1210_s19 }
 0x310   :  { %910 = vrot.lane.b32.xlu1 %v1315_v24, %s1212_s20 }
 0x315   :  { %797 = vrot.lane.b32.xlu2 %v1247_v2, %s1212_s20 }
 0x335   :  { %v1500_v46 = vpop.xlane.xlu0 %471 }
 0x336   :  { %v1487_v26 = vpop.xlane.xlu2 %462  ;;  %vm559_vm3 = vweird.f32 %v1500_v46  ;;  %v565_v47 = vand.u32 2147483648, %v1500_v46 }
 0x337   :  { %1159 = vrcp.f32 %v1487_v26  ;;  %v520_v12 = vand.u32 2147483648, %v1487_v26  ;;  %vm514_vm13 = vweird.f32 %v1487_v26  ;;  %v518_v20 = vand.u32 2147483647, %v1487_v26 }
 0x339   :  { %v521_v23 = vor.u32 1.1754944e-38, %v520_v12  ;;  %vm519_vm5 = vcmp.eq.f32.partialorder %v518_v20, 8.507059e+37 }
 0x33d   :  { %v1498_v8 = vpop.eup %1159 }
 0x33e   :  { %v1489_v41 = vpop.xlane.xlu2 %468  ;;  %v510_v52 = vmul.f32 %v1498_v8, %v1487_v26  ;;  %vm515_vm12 = vweird.f32 %v1498_v8 }
 0x33f   :  { %1161 = vrcp.f32 %v1489_v41  ;;  %vm1542_vm14 = vmor %vm514_vm13, %vm515_vm12  ;;  %v550_v27 = vand.u32 2147483648, %v1489_v41  ;;  %vm544_vm4 = vweird.f32 %v1489_v41  ;;  %v548_v40 = vand.u32 2147483647, %v1489_v41 }
 0x340   :  { %v511_v0 = vsub.f32 1.0, %v510_v52 }
 0x341   :  { %vm549_vm9 = vcmp.eq.f32.partialorder %v548_v40, 8.507059e+37 }
 0x342   :  { %v1491_v33 = vpop.xlane.xlu1 %474  ;;  %v512_v61 = vmul.f32 %v1498_v8, %v511_v0 }
 0x343   :  { %1163 = vrcp.f32 %v1491_v33  ;;  %v580_v42 = vand.u32 2147483648, %v1491_v33  ;;  %vm574_vm7 = vweird.f32 %v1491_v33  ;;  %v578_v19 = vand.u32 2147483647, %v1491_v33 }
 0x344   :  { %1165 = vrcp.f32 %v1500_v46  ;;  %v513_v3 = vadd.f32 %v1498_v8, %v512_v61 }
 0x345   :  { %v1509_v55 = vpop.eup %1161  ;;  %v581_v52 = vor.u32 1.1754944e-38, %v580_v42  ;;  %vm579_vm11 = vcmp.eq.f32.partialorder %v578_v19, 8.507059e+37 }
 0x346   :  { %v540_v1 = vmul.f32 %v1509_v55, %v1489_v41  ;;  %vm545_vm15 = vweird.f32 %v1509_v55  ;;  %v517_v35 = vsel %vm1542_vm14, %v1498_v8, %v513_v3  ;;  %v551_v41 = vor.u32 1.1754944e-38, %v550_v27 }
 0x347   :  { %vm1561_vm6 = vmor %vm544_vm4, %vm545_vm15  ;;  %v522_v26 = vsel %vm519_vm5, %v521_v23, %v517_v35  ;;  %v563_v8 = vand.u32 2147483647, %v1500_v46 }
 0x348   :  { %v541_v62 = vsub.f32 1.0, %v540_v1 }
 0x349   :  { %v1512_v56 = vpop.eup %1163  ;;  %vm564_vm5 = vcmp.eq.f32.partialorder %v563_v8, 8.507059e+37 }
 0x34a   :  { %v1507_v53 = vpop.xlane.xlu1 %477  ;;  %v570_v57 = vmul.f32 %v1512_v56, %v1491_v33  ;;  %v1522_v60 = vpop.eup %1165  ;;  %v542_v14 = vmul.f32 %v1509_v55, %v541_v62  ;;  %vm575_vm2 = vweird.f32 %v1512_v56 }
 0x34b   :  { %1167 = vrcp.f32 %v1507_v53  ;;  %v555_v10 = vmul.f32 %v1522_v60, %v1500_v46  ;;  %vm1573_vm8 = vmor %vm574_vm7, %vm575_vm2  ;;  %vm560_vm10 = vweird.f32 %v1522_v60  ;;  %vm589_vm14 = vweird.f32 %v1507_v53 }
 0x34c   :  { %v571_v5 = vsub.f32 1.0, %v570_v57  ;;  %v543_v31 = vadd.f32 %v1509_v55, %v542_v14  ;;  %vm1598_vm15 = vmor %vm559_vm3, %vm560_vm10  ;;  %v593_v46 = vand.u32 2147483647, %v1507_v53  ;;  %v765_v14 = vpop.permute.xlu0 %764 }
 0x34d   :  { %v556_v18 = vsub.f32 1.0, %v555_v10  ;;  %v595_v10 = vand.u32 2147483648, %v1507_v53 }
 0x34e   :  { %v572_v16 = vmul.f32 %v1512_v56, %v571_v5  ;;  %v547_v48 = vsel %vm1561_vm6, %v1509_v55, %v543_v31  ;;  %vm594_vm7 = vcmp.eq.f32.partialorder %v593_v46, 8.507059e+37 }
 0x34f   :  { %v557_v38 = vmul.f32 %v1522_v60, %v556_v18  ;;  %v552_v1 = vsel %vm549_vm9, %v551_v41, %v547_v48 }
 0x350   :  { %v573_v36 = vadd.f32 %v1512_v56, %v572_v16  ;;  %v553_v12 = vmul.f32 %v1447_v50, %v552_v1  ;;  %v596_v16 = vor.u32 1.1754944e-38, %v595_v10  ;;  %v1213_v10 = vmov 32.0  }
 0x351   :  { %v1525_v4 = vpop.eup %1167  ;;  %v558_v0 = vadd.f32 %v1522_v60, %v557_v38 }
 0x352   :  { %v585_v15 = vmul.f32 %v1525_v4, %v1507_v53  ;;  %v577_v33 = vsel %vm1573_vm8, %v1512_v56, %v573_v36  ;;  %vm590_vm13 = vweird.f32 %v1525_v4 }
 0x353   :  { %v582_v61 = vsel %vm579_vm11, %v581_v52, %v577_v33  ;;  %vm1607_vm4 = vmor %vm589_vm14, %vm590_vm13 }
 0x354   :  { %v586_v32 = vsub.f32 1.0, %v585_v15  ;;  %v562_v15 = vsel %vm1598_vm15, %v1522_v60, %v558_v0 }
 0x356   :  { %v587_v51 = vmul.f32 %v1525_v4, %v586_v32 }
 0x358   :  { %v1502_v2 = vpop.xlane.xlu2 %465  ;;  %v588_v56 = vadd.f32 %v1525_v4, %v587_v51 }
 0x359   :  { %1169 = vrcp.f32 %v1502_v2  ;;  %vm529_vm2 = vweird.f32 %v1502_v2  ;;  %v533_v3 = vand.u32 2147483647, %v1502_v2 }
 0x35a   :  { %v592_v53 = vsel %vm1607_vm4, %v1525_v4, %v588_v56  ;;  %1171 = vrcp.f32 %v1213_v10 }
 0x35b   :  { %vm534_vm6 = vcmp.eq.f32.partialorder %v533_v3, 8.507059e+37  ;;  %v597_v20 = vsel %vm594_vm7, %v596_v16, %v592_v53 }
 0x35c   :  { %v598_v23 = vmul.f32 %v1455_v58, %v597_v20 }
 0x35f   :  { %v1527_v9 = vpop.eup %1169 }
 0x360   :  { %v1111_v59 = vpop.permute.xlu2 %1110  ;;  %v525_v17 = vmul.f32 %v1527_v9, %v1502_v2  ;;  %vm530_vm12 = vweird.f32 %v1527_v9 }
 0x361   :  { %v1112_v13 = vunpack.i.l.bf16 %v1111_v59  ;;  %v1113_v24 = vunpack.i.h.bf16 %v1111_v59  ;;  %v523_v59 = vmul.f32 %v1441_v44, %v522_v26  ;;  %v535_v44 = vand.u32 2147483648, %v1502_v2  ;;  %vm531_vm3 = vmor %vm529_vm2, %vm530_vm12 }
 0x362   :  { %v1106_v63 = vpop.permute.xlu1 %1105  ;;  %v526_v30 = vsub.f32 1.0, %v525_v17 }
 0x363   :  { %v1107_v6 = vunpack.i.l.bf16 %v1106_v63  ;;  %v1108_v7 = vunpack.i.h.bf16 %v1106_v63  ;;  %v536_v17 = vor.u32 1.1754944e-38, %v535_v44  ;;  %v1172_v44 = vpop.eup %1171 }
 0x364   :  { %v527_v39 = vmul.f32 %v1527_v9, %v526_v30 }
 0x365   :  { %670 = vmatpush.msrb.mxu3 %v1108_v7  ;;  %752 = vmatpush.msra.mxu2 %v1107_v6 }
 0x366   :  { %v528_v7 = vadd.f32 %v1527_v9, %v527_v39 }
 0x367   :  { %671 = vmatpush.msrb.mxu3 %v1113_v24  ;;  %753 = vmatpush.msra.mxu2 %v1112_v13  ;;  %v583_v24 = vmul.f32 %v1451_v54, %v582_v61  ;;  %v566_v54 = vor.u32 1.1754944e-38, %v565_v47  ;;  %v1179_v13 = vld [vmem:[%s1666_s1 + $0x20] sm:$0xff] }
 0x368   :  { %v1121_v21 = vpop.permute.xlu2 %1120  ;;  %v532_v2 = vsel %vm531_vm3, %v1527_v9, %v528_v7 }
 0x369   :  { %v1122_v29 = vunpack.i.l.bf16 %v1121_v21  ;;  %v1123_v45 = vunpack.i.h.bf16 %v1121_v21  ;;  %v567_v18 = vsel %vm564_vm5, %v566_v54, %v562_v15  ;;  %v537_v60 = vsel %vm534_vm6, %v536_v17, %v532_v2 }
 0x36a   :  { %v1116_v34 = vpop.permute.xlu1 %1115  ;;  %v568_v21 = vmul.f32 %v1439_v43, %v567_v18  ;;  %v538_v22 = vmul.f32 %v1461_v11, %v537_v60 }
 0x36b   :  { %v1118_v25 = vunpack.i.h.bf16 %v1116_v34  ;;  %v1117_v37 = vunpack.i.l.bf16 %v1116_v34  ;;  %672 = vmatpush.msrb.mxu3 %v1122_v29 }
 0x36d   :  { %711 = vmatpush.msrb.mxu1 %v1117_v37  ;;  %754 = vmatpush.msra.mxu2 %v1118_v25 }
 0x36f   :  { %712 = vmatpush.msrb.mxu1 %v1123_v45 }
 0x370   :  { %v1131_v55 = vpop.permute.xlu2 %1130 }
 0x371   :  { %v1132_v57 = vunpack.i.l.bf16 %v1131_v55  ;;  %v1133_v63 = vunpack.i.h.bf16 %v1131_v55  ;;  %v1177_v55 = vld [vmem:[%s1665_s0] sm:$0xff] }
 0x372   :  { %v1126_v62 = vpop.permute.xlu1 %1125 }
 0x373   :  { %v1127_v5 = vunpack.i.l.bf16 %v1126_v62  ;;  %713 = vmatpush.msrb.mxu1 %v1132_v57  ;;  %v1128_v6 = vunpack.i.h.bf16 %v1126_v62 }
 0x374   :  { %v634_v4 = vpop.f32.mrf.mxu2 }
 0x375   :  { %714 = vmatpush.msrb.mxu1 %v1133_v63  ;;  %673 = vmatpush.msrb.mxu3 %v1128_v6 }
 0x376   :  { %1037 = vmatmul.msk.f32.vlgmr.msrb.gmra.mxu1 %vm29_vm0, %v553_v12  ;;  %755 = vmatpush.msra.mxu2 %v1127_v5  ;;  %v1178_v5 = vld [vmem:[%s1665_s0 + $0x8] sm:$0xff]  ;;  %v924_v12 = vmul.f32 32.0, %v1172_v44  ;;  %s1214_s0 = smov [#allocation2]  }
 0x377   :  { %1035 = vmatmul.msk.f32.vlgmr.msrb.gmra.mxu3 %vm29_vm0, %v523_v59  ;;  %1039 = vmatmul.msk.f32.vlgmr.msra.gmra.mxu2 %vm29_vm0, %v583_v24  ;;  %v968_v24 = vperm.slane %v1179_v13, 1  ;;  %s983_s1 = sshll.u32 %s1214_s0, 4  ;;  %s984_s1 = int_to_ptr.vmem [resolvable:$true] %s983_s1 }
 0x378   :  { %788 = vmatpush.msra.mxu3 %v765_v14  ;;  %v798_v27 = vpop.permute.xlu2 %797  ;;  %v925_v3 = vsub.f32 1.0, %v924_v12 }
 0x379   :  { %821 = vmatpush.msra.mxu1 %v798_v27 }
 0x37a   :  { %v1136_v29 = vpop.permute.xlu1 %1135  ;;  %v926_v50 = vmul.f32 %v1172_v44, %v925_v3 }
 0x37b   :  { %v1138_v43 = vunpack.i.h.bf16 %v1136_v29  ;;  %v1137_v31 = vunpack.i.l.bf16 %v1136_v29 }
 0x37c   :  { %v637_v9 = vpop.f32.mrf.mxu2  ;;  %v927_v46 = vadd.f32 %v1172_v44, %v926_v50 }
 0x37d   :  { %854 = vmatpush.msrb.mxu2 %v1137_v31  ;;  %887 = vmatpush.msrb.mxu3 %v1138_v43 }
 0x37e   :  { %1038 = vmatmul.msk.f32.gmra.mxu1 %vm29_vm0, %v568_v21 }
 0x37f   :  { %1036 = vmatmul.msk.f32.gmra.mxu3 %vm29_vm0, %v538_v22  ;;  %1040 = vmatmul.msk.f32.gmra.mxu2 %vm29_vm0, %v598_v23 }
 0x382   :  { %v911_v49 = vpop.permute.xlu1 %910 }
 0x387   :  { %1041 = vmatmul.msk.f32.vlgmr.msra.gmra.mxu3 %vm214_vm1, %v634_v4 }
 0x38f   :  { %1042 = vmatmul.msk.f32.gmra.mxu3 %vm214_vm1, %v637_v9 }
 0x3f3   :  { %v716_v58 = vpop.f32.mrf.mxu1 }
 0x3f4   :  { %1045 = vmatmul.msk.f32.vlgmr.msrb.gmra.mxu2 %vm214_vm1, %v716_v58 }
 0x3fa   :  { %v675_v11 = vpop.f32.mrf.mxu3  ;;  %v757_v32 = vpop.f32.mrf.mxu2 }
 0x3fb   :  { %v719_v34 = vpop.f32.mrf.mxu1  ;;  %1043 = vmatmul.msk.f32.vlgmr.msra.gmra.mxu1 %vm214_vm1, %v675_v11  ;;  %1047 = vmatmul.msk.f32.vlgmr.msrb.gmra.mxu3 %vm214_vm1, %v757_v32 }
 0x3fc   :  { %1046 = vmatmul.msk.f32.gmra.mxu2 %vm214_vm1, %v719_v34 }
 0x402   :  { %v678_v35 = vpop.f32.mrf.mxu3  ;;  %v760_v36 = vpop.f32.mrf.mxu2 }
 0x403   :  { %1044 = vmatmul.msk.f32.gmra.mxu1 %vm214_vm1, %v678_v35  ;;  %1048 = vmatmul.msk.f32.gmra.mxu3 %vm214_vm1, %v760_v36  ;;  %vm928_vm1 = vweird.f32 %v1172_v44 }
 0x404   :  { %v929_v14 = vsel %vm928_vm1, %v1172_v44, %v927_v46 }
 0x40a   :  { %v790_v30 = vpop.f32.mrf.mxu3 }
 0x40b   :  { %v895_v40 = vsel %vm29_vm0, %v790_v30, 0.0 }
 0x412   :  { %v793_v25 = vpop.f32.mrf.mxu3 }
 0x413   :  { %v902_v41 = vsel %vm29_vm0, %v793_v25, 0.0 }
 0x477   :  { %v856_v37 = vpop.f32.mrf.mxu2 }
 0x478   :  { %v823_v38 = vpop.f32.mrf.mxu1  ;;  %v898_v19 = vsel %vm29_vm0, %v856_v37, 0.0 }
 0x479   :  { %v896_v42 = vsel %vm29_vm0, %v823_v38, 0.0 }
 0x47a   :  { %v897_v28 = vadd.f32 %v896_v42, %v895_v40 }
 0x47c   :  { %v899_v47 = vadd.f32 %v898_v19, %v897_v28 }
 0x47e   :  { %v889_v45 = vpop.f32.mrf.mxu3 }
 0x47f   :  { %v900_v48 = vsel %vm29_vm0, %v889_v45, 0.0  ;;  %v859_v39 = vpop.f32.mrf.mxu2 }
 0x480   :  { %v901_v51 = vadd.f32 %v900_v48, %v899_v47  ;;  %v826_v26 = vpop.f32.mrf.mxu1  ;;  %v905_v1 = vsel %vm29_vm0, %v859_v39, 0.0 }
 0x481   :  { %v903_v33 = vsel %vm29_vm0, %v826_v26, 0.0 }
 0x482   :  { %v904_v8 = vadd.f32 %v903_v33, %v902_v41  ;;  %v913_v52 = vadd.f32 %v911_v49, %v901_v51 }
 0x484   :  { %v915_v0 = vadd.f32 %v1177_v55, %v913_v52  ;;  %v906_v59 = vadd.f32 %v905_v1, %v904_v8 }
 0x486   :  { %v892_v57 = vpop.f32.mrf.mxu3  ;;  %v917_v61 = vsel %vm29_vm0, %v915_v0, 0.0 }
 0x487   :  { %v907_v62 = vsel %vm29_vm0, %v892_v57, 0.0  ;;  %918 = vadd.xlane.f32.xlu2 %v917_v61 }
 0x488   :  { %v908_v56 = vadd.f32 %v907_v62, %v906_v59 }
 0x48a   :  { %v914_v63 = vadd.f32 %v911_v49, %v908_v56 }
 0x48c   :  { %v916_v6 = vadd.f32 %v1178_v5, %v914_v63 }
 0x48e   :  { %v920_v7 = vsel %vm29_vm0, %v916_v6, 0.0 }
 0x48f   :  { %921 = vadd.xlane.f32.xlu1 %v920_v7 }
 0x4a8   :  { %972 = vrot.lane.b32.xlu1 %v968_v24, %s1209_s18 }
 0x4fa   :  { %v919_v15 = vpop.xlane.xlu2 %918 }
 0x4fb   :  { %v930_v54 = vmul.f32 %v929_v14, %v919_v15 }
 0x4fd   :  { %v932_v2 = vsub.f32 %v915_v0, %v930_v54 }
 0x4ff   :  { %v934_v53 = vmul.f32 %v932_v2, %v932_v2 }
 0x501   :  { %v936_v16 = vsel %vm29_vm0, %v934_v53, 0.0 }
 0x502   :  { %937 = vadd.xlane.f32.xlu0 %v936_v16  ;;  %v922_v17 = vpop.xlane.xlu1 %921 }
 0x503   :  { %v931_v18 = vmul.f32 %v929_v14, %v922_v17 }
 0x505   :  { %v933_v60 = vsub.f32 %v916_v6, %v931_v18 }
 0x507   :  { %v935_v20 = vmul.f32 %v933_v60, %v933_v60 }
 0x509   :  { %v939_v21 = vsel %vm29_vm0, %v935_v20, 0.0 }
 0x50a   :  { %940 = vadd.xlane.f32.xlu2 %v939_v21 }
 0x51a   :  { %v973_v40 = vpop.permute.xlu1 %972 }
 0x575   :  { %v938_v22 = vpop.xlane.xlu0 %937 }
 0x576   :  { %v942_v23 = vmul.f32 %v938_v22, %v929_v14 }
 0x578   :  { %v944_v4 = vadd.f32 1e-05, %v942_v23 }
 0x57a   :  { %1173 = vrsqrt.f32 %v944_v4  ;;  %vm952_vm9 = vweird.f32 %v944_v4 }
 0x57d   :  { %v941_v9 = vpop.xlane.xlu2 %940 }
 0x57e   :  { %v943_v27 = vmul.f32 %v941_v9, %v929_v14 }
 0x580   :  { %v1174_v29 = vpop.eup %1173  ;;  %v945_v43 = vadd.f32 1e-05, %v943_v27 }
 0x581   :  { %v947_v31 = vmul.f32 %v1174_v29, %v944_v4  ;;  %vm953_vm8 = vweird.f32 %v1174_v29 }
 0x582   :  { %1175 = vrsqrt.f32 %v945_v43  ;;  %vm954_vm10 = vmor %vm952_vm9, %vm953_vm8  ;;  %vm962_vm12 = vweird.f32 %v945_v43 }
 0x583   :  { %v948_v58 = vmul.f32 %v1174_v29, %v947_v31 }
 0x585   :  { %v949_v11 = vmul.f32 0.5, %v948_v58 }
 0x587   :  { %v950_v32 = vsub.f32 1.5, %v949_v11 }
 0x588   :  { %v1176_v34 = vpop.eup %1175 }
 0x589   :  { %v957_v35 = vmul.f32 %v1176_v34, %v945_v43  ;;  %v951_v36 = vmul.f32 %v1174_v29, %v950_v32  ;;  %vm963_vm11 = vweird.f32 %v1176_v34 }
 0x58a   :  { %vm964_vm13 = vmor %vm962_vm12, %vm963_vm11 }
 0x58b   :  { %v958_v30 = vmul.f32 %v1176_v34, %v957_v35  ;;  %v955_v25 = vsel %vm954_vm10, %v1174_v29, %v951_v36 }
 0x58c   :  { %v966_v37 = vmul.f32 %v955_v25, %v932_v2 }
 0x58d   :  { %v959_v38 = vmul.f32 0.5, %v958_v30 }
 0x58e   :  { %v969_v42 = vmul.f32 %v968_v24, %v966_v37 }
 0x58f   :  { %v960_v28 = vsub.f32 1.5, %v959_v38 }
 0x590   :  { %v975_v19 = vadd.f32 %v973_v40, %v969_v42 }
 0x591   :  { %v961_v45 = vmul.f32 %v1176_v34, %v960_v28 }
 0x592   :  { %977 = vst.msk [vmem:[#allocation2] sm:$0xff] %vm29_vm0, %v975_v19 }
 0x593   :  { %v965_v47 = vsel %vm964_vm13, %v1176_v34, %v961_v45 }
 0x594   :  { %v967_v48 = vmul.f32 %v965_v47, %v933_v60 }
 0x596   :  { %v970_v49 = vmul.f32 %v968_v24, %v967_v48 }
 0x598   :  { %v976_v51 = vadd.f32 %v973_v40, %v970_v49 }
 0x59a   :  { %978 = vst.msk [vmem:[#allocation2 + $0x8] sm:$0xff] %vm29_vm0, %v976_v51 }
 0x59b   :  { %991 = dma.vmem_to_hbm [thread:$0]  %s984_s1, 256, %s986_s29, [#allocation3], %s1215_s30, %s1215_s30, %s1216_s3  }
 0x59c   :  { %1204 = dma.done.wait [#allocation3], 256  }
 0x59d   :  { %1205 = vsyncadd [#allocation3], 4294967040 }
 0x59e   :  { %996 = vsyncpa [#allocation3], 1 }

</bundles_post_ra>
